<compile_context>
chip_gen: v5e
topology: v5e:2x2
jax: 0.10.0
libtpu: 0.0.40
codegen_flags: <defaults>
</compile_context>

<pallas_src>
import jax
import jax.numpy as jnp
import numpy as np
from jax.experimental import pallas as pl
from jax.experimental.pallas import tpu as pltpu

GRID_SIZE = 5
SPLINE_ORDER = 3
NB = GRID_SIZE + SPLINE_ORDER            # b-spline basis functions per input (=8)
NG = GRID_SIZE + 2 * SPLINE_ORDER + 1    # grid points per input (=12)

PAD = 128      # lane-padded feature width used for every layer
B_PAD = 8      # sublane-padded batch block

# Uniform efficient-KAN init grid, baked as compile-time constants.
# Computed in f32 step-by-step exactly like the reference (arange * h - 1).
_H32 = np.float32(2.0 / GRID_SIZE)
_GRID_1D = [
    float(np.float32(i) * _H32 - np.float32(1.0))
    for i in range(-SPLINE_ORDER, GRID_SIZE + SPLINE_ORDER + 1)
]
# uniform grid => Cox-de Boor denominators are k*h; precompute reciprocals (no divides).
_INV_DEN = [0.0] + [1.0 / (k * float(_H32)) for k in range(1, SPLINE_ORDER + 1)]


# ---------------------------------------------------------------------------
# Fused Pallas kernel
# ---------------------------------------------------------------------------
def _kan_layer(x, base_w, spline_w_flat):
    """One KANLinear layer on a lane-padded (B_PAD, PAD) activation.

    base_w:        (PAD, PAD)       base_weight.T, zero-padded
    spline_w_flat: (NB*PAD, PAD)    scaled_spline_weight, (k, in)-major flattened, zero-padded
    """
    # Cox–de Boor recursion with compile-time scalar knots and reciprocal denominators.
    d = [x - _GRID_1D[i] for i in range(NG)]                        # (B, In) each
    bases = [
        jnp.logical_and(x >= _GRID_1D[i], x < _GRID_1D[i + 1]).astype(jnp.float32)
        for i in range(NG - 1)
    ]
    for k in range(1, SPLINE_ORDER + 1):
        inv = _INV_DEN[k]
        bases = [
            inv * (d[i] * bases[i] - d[i + k + 1] * bases[i + 1])
            for i in range(NG - 1 - k)
        ]
    # k-major basis slab: one big MXU contraction instead of NB tiny dots.
    basis_slab = jnp.concatenate(bases, axis=-1)                    # (B, NB*PAD)

    # base path: silu(x) @ base_weight.T  (reciprocal kept exact for the 1e-4 check)
    sig = pl.reciprocal(1.0 + jnp.exp(-x), approx=False)
    acc = jnp.dot(x * sig, base_w, preferred_element_type=jnp.float32)
    acc = acc + jnp.dot(basis_slab, spline_w_flat, preferred_element_type=jnp.float32)
    return acc


def fused_kanshap_kernel(x_ref, bw_ref, sw_ref, delta_ref, out_ref, act_ref):
    """Grid = (batch_blocks, n_layers).  One KANLinear layer per inner grid step;
    the activation stays resident in VMEM scratch across the layer axis."""
    l = pl.program_id(1)

    @pl.when(l == 0)
    def _():
        act_ref[...] = x_ref[...]

    act_ref[...] = _kan_layer(act_ref[...], bw_ref[...], sw_ref[...])

    @pl.when(l == pl.num_programs(1) - 1)
    def _():
        # predict_class already folded into the last layer's weights; add delta bias.
        out_ref[...] = act_ref[...] + delta_ref[...]


# ---------------------------------------------------------------------------
# Wrapper
# ---------------------------------------------------------------------------
def fused_forward(x_pad, bw_stack, sw_stack, delta_pad, *, blk_b=B_PAD):
    n_rows = x_pad.shape[0]
    n_layers = bw_stack.shape[0]
    assert n_rows % blk_b == 0
    return pl.pallas_call(
        fused_kanshap_kernel,
        out_shape=jax.ShapeDtypeStruct((n_rows, PAD), jnp.float32),
        grid_spec=pltpu.PrefetchScalarGridSpec(
            num_scalar_prefetch=0,
            grid=(n_rows // blk_b, n_layers),
            in_specs=[
                pl.BlockSpec((blk_b, PAD), lambda b, l: (b, 0)),           # activation in
                pl.BlockSpec((None, PAD, PAD), lambda b, l: (l, 0, 0)),    # base_w[l]
                pl.BlockSpec((None, NB * PAD, PAD), lambda b, l: (l, 0, 0)),  # spline_w[l]
                pl.BlockSpec((1, PAD), lambda b, l: (0, 0)),               # delta (tiny)
            ],
            out_specs=pl.BlockSpec((blk_b, PAD), lambda b, l: (b, 0)),
            scratch_shapes=[pltpu.VMEM((blk_b, PAD), jnp.float32)],
        ),
        compiler_params=pltpu.CompilerParams(
            dimension_semantics=("parallel", "arbitrary"),
            vmem_limit_bytes=8 * 1024 * 1024,
        ),
    )(x_pad, bw_stack, sw_stack, delta_pad)


# ---------------------------------------------------------------------------
# Main: deterministic params, small shapes, compare vs plain-JAX reference
# ---------------------------------------------------------------------------
if __name__ == "__main__":
    key = jax.random.PRNGKey(0)
    keys = iter(jax.random.split(key, 64))

    # module configuration (small, consistent with the torch module)
    N_NUM = 4                       # numerical columns
    CAT_CARD = [5, 7]               # nunique() per categorical column
    N_CAT = len(CAT_CARD)
    EMB_DIM = 32
    NUM_FEATURES = N_NUM + N_CAT    # 6
    NUM_CLASSES = 3
    B = 2
    LAYERS = [N_CAT * EMB_DIM + N_NUM, 64, 128, 64, NUM_FEATURES * NUM_CLASSES]

    # Embed: one nn.Embedding(nunique+1, 32) per categorical column
    emb_tables = [
        jax.random.uniform(next(keys), (c + 1, EMB_DIM), jnp.float32, -0.5, 0.5)
        for c in CAT_CARD
    ]

    # efficient-KAN grid (reference layout): arange(-order, grid+order+1)*h - 1
    grid_1d = (
        jnp.arange(-SPLINE_ORDER, GRID_SIZE + SPLINE_ORDER + 1, dtype=jnp.float32)
        * (2.0 / GRID_SIZE)
        - 1.0
    )  # (NG,)

    kan_layers = []
    for li in range(len(LAYERS) - 1):
        din, dout = LAYERS[li], LAYERS[li + 1]
        s = 1.0 / float(jnp.sqrt(jnp.float32(din)))
        base_w = jax.random.uniform(next(keys), (dout, din), jnp.float32, -s, s)
        spline_w = jax.random.uniform(next(keys), (dout, din, NB), jnp.float32, -s, s) * 0.3
        scaler = jax.random.uniform(next(keys), (dout, din), jnp.float32, 0.8, 1.2)
        spline_scaled = spline_w * scaler[:, :, None]      # scaled_spline_weight
        grid = jnp.tile(grid_1d[None, :], (din, 1))        # torch layout (In, NG)
        kan_layers.append(dict(grid=grid, base_w=base_w, spline_scaled=spline_scaled))

    # predict_class params (add_bias=True, link_func=False)
    delta = jax.random.uniform(next(keys), (NUM_CLASSES,), jnp.float32, -0.1, 0.1)
    sel = jnp.kron(
        jnp.eye(NUM_CLASSES, dtype=jnp.float32),
        jnp.ones((NUM_FEATURES, 1), dtype=jnp.float32),
    )  # (C*F, C): "sum over features per class" selector — exact linear fold target

    # ---- host-side weight prep: transpose, fold predict_class, pad to 128 lanes ----
    def prep_layer(base_w, spline_scaled, fold=None):
        din = base_w.shape[1]
        bwt = base_w.T                                   # (in, out)
        swt = jnp.transpose(spline_scaled, (2, 1, 0))    # (NB, in, out)
        if fold is not None:                             # fold predict_class into last layer
            bwt = bwt @ fold                             # (in, C)
            swt = swt @ fold                             # (NB, in, C)
        dout = bwt.shape[1]
        bw_p = jnp.zeros((PAD, PAD), jnp.float32).at[:din, :dout].set(bwt)
        sw_p = jnp.zeros((NB, PAD, PAD), jnp.float32).at[:, :din, :dout].set(swt)
        return bw_p, sw_p.reshape(NB * PAD, PAD)         # k-major flattening

    bw_list, sw_list = [], []
    for li, lyr in enumerate(kan_layers):
        fold = sel if li == len(kan_layers) - 1 else None
        bw_p, sw_p = prep_layer(lyr["base_w"], lyr["spline_scaled"], fold)
        bw_list.append(bw_p)
        sw_list.append(sw_p)
    bw_stack = jnp.stack(bw_list)                        # (4, PAD, PAD)
    sw_stack = jnp.stack(sw_list)                        # (4, NB*PAD, PAD)

    delta_pad = jnp.zeros((1, PAD), jnp.float32).at[0, :NUM_CLASSES].set(delta)

    # input: [numerical floats | categorical codes stored as floats]
    num_x = jax.random.uniform(next(keys), (B, N_NUM), jnp.float32, -1.0, 1.0)
    cat_x = jnp.stack(
        [jax.random.randint(next(keys), (B,), 0, c + 1) for c in CAT_CARD], axis=1
    )
    x_in = jnp.concatenate([num_x, cat_x.astype(jnp.float32)], axis=1)  # (2, 6)

    # Embed.forward — data-dependent gather + concat kept as plain-JAX glue.
    # TODO(synk): could be folded into the kernel via scalar-prefetched codes + in-VMEM
    # row gather; left host-side (sub-µs) to keep the kernel simple.
    def embed(x):
        numerical_x = x[:, :N_NUM]
        nominal_x = x[:, N_NUM:].astype(jnp.int32)
        embs = [emb_tables[i][nominal_x[:, i]] for i in range(N_CAT)]
        return jnp.concatenate([numerical_x] + embs, axis=1)

    def forward_pallas(x):
        h = embed(x)                                                  # (B, 68)
        hp = jnp.zeros((B_PAD, PAD), jnp.float32).at[:B, : h.shape[1]].set(h)
        out_p = fused_forward(hp, bw_stack, sw_stack, delta_pad)      # (8, 128)
        return out_p[:B, :NUM_CLASSES]

    # pure-JAX reference (mirrors torch efficient-KAN + predict_class exactly)
    def b_splines_ref(x, grid):
        xe = x[..., None]
        bases = jnp.logical_and(xe >= grid[:, :-1], xe < grid[:, 1:]).astype(x.dtype)
        for k in range(1, SPLINE_ORDER + 1):
            bases = (
                (xe - grid[:, : -(k + 1)])
                / (grid[:, k:-1] - grid[:, : -(k + 1)])
                * bases[..., :-1]
                + (grid[:, k + 1:] - xe)
                / (grid[:, k + 1:] - grid[:, 1:-k])
                * bases[..., 1:]
            )
        return bases

    def forward_ref(x):
        h = embed(x)
        for lyr in kan_layers:
            base = jax.nn.silu(h) @ lyr["base_w"].T
            spl = (
                b_splines_ref(h, lyr["grid"]).reshape(h.shape[0], -1)
                @ lyr["spline_scaled"].reshape(lyr["spline_scaled"].shape[0], -1).T
            )
            h = base + spl
        return h.reshape(h.shape[0], NUM_CLASSES, NUM_FEATURES).sum(axis=-1) + delta

    out = jax.block_until_ready(forward_pallas(x_in))
    ref = forward_ref(x_in)
    assert out.shape == (B, NUM_CLASSES)
    assert jnp.allclose(out, ref, atol=1e-4, rtol=1e-4)
    print("KERNEL_OK")
</pallas_src>

<mosaic_0001>
module attributes {stable_mosaic.version = 11 : i64} {
  func.func @fused_kanshap_kernel(%arg0: i32, %arg1: i32, %arg2: memref<8x128xf32, #tpu.memory_space<vmem>>, %arg3: memref<1x128x128xf32, #tpu.memory_space<vmem>>, %arg4: memref<1x1024x128xf32, #tpu.memory_space<vmem>>, %arg5: memref<1x128xf32, #tpu.memory_space<vmem>>, %arg6: memref<8x128xf32, #tpu.memory_space<vmem>>, %arg7: memref<8x128xf32, #tpu.memory_space<vmem>>) attributes {dimension_semantics = [#tpu.dimension_semantics<parallel>, #tpu.dimension_semantics<arbitrary>], iteration_bounds = array<i64: 1, 4>, scalar_prefetch = 0 : i64, scratch_operands = 1 : i64, tpu.core_type = #tpu.core_type<tc>, window_params = [{transform_indices = @transform_0, window_bounds = array<i64: 8, 128>}, {transform_indices = @transform_1, window_bounds = array<i64: 1, 128, 128>}, {transform_indices = @transform_2, window_bounds = array<i64: 1, 1024, 128>}, {pipeline_mode = #tpu.pipeline_mode<synchronous>, transform_indices = @transform_3, window_bounds = array<i64: 1, 128>}, {transform_indices = @transform_4, window_bounds = array<i64: 8, 128>}]} {
    %c0_i32 = arith.constant 0 : i32
    %0 = arith.cmpi eq, %arg1, %c0_i32 : i32
    %1 = arith.extui %0 : i1 to i32
    %c0_i32_0 = arith.constant 0 : i32
    %2 = arith.cmpi ne, %1, %c0_i32_0 : i32
    scf.if %2 {
      %c0_75 = arith.constant 0 : index
      %c0_76 = arith.constant 0 : index
      %259 = vector.load %arg2[%c0_75, %c0_76] : memref<8x128xf32, #tpu.memory_space<vmem>>, vector<8x128xf32>
      %c0_77 = arith.constant 0 : index
      %c0_78 = arith.constant 0 : index
      %260 = vector.load %arg7[%c0_77, %c0_78] : memref<8x128xf32, #tpu.memory_space<vmem>>, vector<8x128xf32>
      tpu.vector_store %arg7[%c0_77, %c0_78], %259 {strides = array<i32>} : memref<8x128xf32, #tpu.memory_space<vmem>>, vector<8x128xf32>,
    } else {
    }
    %c0 = arith.constant 0 : index
    %c0_1 = arith.constant 0 : index
    %3 = vector.load %arg7[%c0, %c0_1] : memref<8x128xf32, #tpu.memory_space<vmem>>, vector<8x128xf32>
    %c0_2 = arith.constant 0 : index
    %c0_3 = arith.constant 0 : index
    %c0_4 = arith.constant 0 : index
    %4 = vector.load %arg3[%c0_2, %c0_3, %c0_4] : memref<1x128x128xf32, #tpu.memory_space<vmem>>, vector<1x128x128xf32>
    %5 = vector.shape_cast %4 : vector<1x128x128xf32> to vector<128x128xf32>
    %c0_5 = arith.constant 0 : index
    %c0_6 = arith.constant 0 : index
    %c0_7 = arith.constant 0 : index
    %6 = vector.load %arg4[%c0_5, %c0_6, %c0_7] : memref<1x1024x128xf32, #tpu.memory_space<vmem>>, vector<1x1024x128xf32>
    %7 = vector.shape_cast %6 : vector<1x1024x128xf32> to vector<1024x128xf32>
    %cst = arith.constant -2.200000e+00 : f32
    %8 = vector.broadcast %cst : f32 to vector<8x128xf32>
    %9 = arith.subf %3, %8 : vector<8x128xf32>
    %cst_8 = arith.constant -1.800000e+00 : f32
    %10 = vector.broadcast %cst_8 : f32 to vector<8x128xf32>
    %11 = arith.subf %3, %10 : vector<8x128xf32>
    %cst_9 = arith.constant -1.400000e+00 : f32
    %12 = vector.broadcast %cst_9 : f32 to vector<8x128xf32>
    %13 = arith.subf %3, %12 : vector<8x128xf32>
    %cst_10 = arith.constant -1.000000e+00 : f32
    %14 = vector.broadcast %cst_10 : f32 to vector<8x128xf32>
    %15 = arith.subf %3, %14 : vector<8x128xf32>
    %cst_11 = arith.constant -6.000000e-01 : f32
    %16 = vector.broadcast %cst_11 : f32 to vector<8x128xf32>
    %17 = arith.subf %3, %16 : vector<8x128xf32>
    %cst_12 = arith.constant -0.199999988 : f32
    %18 = vector.broadcast %cst_12 : f32 to vector<8x128xf32>
    %19 = arith.subf %3, %18 : vector<8x128xf32>
    %cst_13 = arith.constant 0.200000048 : f32
    %20 = vector.broadcast %cst_13 : f32 to vector<8x128xf32>
    %21 = arith.subf %3, %20 : vector<8x128xf32>
    %cst_14 = arith.constant 6.000000e-01 : f32
    %22 = vector.broadcast %cst_14 : f32 to vector<8x128xf32>
    %23 = arith.subf %3, %22 : vector<8x128xf32>
    %cst_15 = arith.constant 1.000000e+00 : f32
    %24 = vector.broadcast %cst_15 : f32 to vector<8x128xf32>
    %25 = arith.subf %3, %24 : vector<8x128xf32>
    %cst_16 = arith.constant 1.4000001 : f32
    %26 = vector.broadcast %cst_16 : f32 to vector<8x128xf32>
    %27 = arith.subf %3, %26 : vector<8x128xf32>
    %cst_17 = arith.constant 1.800000e+00 : f32
    %28 = vector.broadcast %cst_17 : f32 to vector<8x128xf32>
    %29 = arith.subf %3, %28 : vector<8x128xf32>
    %cst_18 = arith.constant 2.200000e+00 : f32
    %30 = vector.broadcast %cst_18 : f32 to vector<8x128xf32>
    %31 = arith.subf %3, %30 : vector<8x128xf32>
    %cst_19 = arith.constant -2.200000e+00 : f32
    %32 = vector.broadcast %cst_19 : f32 to vector<8x128xf32>
    %33 = arith.cmpf oge, %3, %32 : vector<8x128xf32>
    %cst_20 = arith.constant -1.800000e+00 : f32
    %34 = vector.broadcast %cst_20 : f32 to vector<8x128xf32>
    %35 = arith.cmpf olt, %3, %34 : vector<8x128xf32>
    %36 = arith.andi %33, %35 : vector<8x128xi1>
    %37 = arith.extui %36 : vector<8x128xi1> to vector<8x128xi32>
    %38 = arith.sitofp %37 : vector<8x128xi32> to vector<8x128xf32>
    %cst_21 = arith.constant -1.800000e+00 : f32
    %39 = vector.broadcast %cst_21 : f32 to vector<8x128xf32>
    %40 = arith.cmpf oge, %3, %39 : vector<8x128xf32>
    %cst_22 = arith.constant -1.400000e+00 : f32
    %41 = vector.broadcast %cst_22 : f32 to vector<8x128xf32>
    %42 = arith.cmpf olt, %3, %41 : vector<8x128xf32>
    %43 = arith.andi %40, %42 : vector<8x128xi1>
    %44 = arith.extui %43 : vector<8x128xi1> to vector<8x128xi32>
    %45 = arith.sitofp %44 : vector<8x128xi32> to vector<8x128xf32>
    %cst_23 = arith.constant -1.400000e+00 : f32
    %46 = vector.broadcast %cst_23 : f32 to vector<8x128xf32>
    %47 = arith.cmpf oge, %3, %46 : vector<8x128xf32>
    %cst_24 = arith.constant -1.000000e+00 : f32
    %48 = vector.broadcast %cst_24 : f32 to vector<8x128xf32>
    %49 = arith.cmpf olt, %3, %48 : vector<8x128xf32>
    %50 = arith.andi %47, %49 : vector<8x128xi1>
    %51 = arith.extui %50 : vector<8x128xi1> to vector<8x128xi32>
    %52 = arith.sitofp %51 : vector<8x128xi32> to vector<8x128xf32>
    %cst_25 = arith.constant -1.000000e+00 : f32
    %53 = vector.broadcast %cst_25 : f32 to vector<8x128xf32>
    %54 = arith.cmpf oge, %3, %53 : vector<8x128xf32>
    %cst_26 = arith.constant -6.000000e-01 : f32
    %55 = vector.broadcast %cst_26 : f32 to vector<8x128xf32>
    %56 = arith.cmpf olt, %3, %55 : vector<8x128xf32>
    %57 = arith.andi %54, %56 : vector<8x128xi1>
    %58 = arith.extui %57 : vector<8x128xi1> to vector<8x128xi32>
    %59 = arith.sitofp %58 : vector<8x128xi32> to vector<8x128xf32>
    %cst_27 = arith.constant -6.000000e-01 : f32
    %60 = vector.broadcast %cst_27 : f32 to vector<8x128xf32>
    %61 = arith.cmpf oge, %3, %60 : vector<8x128xf32>
    %cst_28 = arith.constant -0.199999988 : f32
    %62 = vector.broadcast %cst_28 : f32 to vector<8x128xf32>
    %63 = arith.cmpf olt, %3, %62 : vector<8x128xf32>
    %64 = arith.andi %61, %63 : vector<8x128xi1>
    %65 = arith.extui %64 : vector<8x128xi1> to vector<8x128xi32>
    %66 = arith.sitofp %65 : vector<8x128xi32> to vector<8x128xf32>
    %cst_29 = arith.constant -0.199999988 : f32
    %67 = vector.broadcast %cst_29 : f32 to vector<8x128xf32>
    %68 = arith.cmpf oge, %3, %67 : vector<8x128xf32>
    %cst_30 = arith.constant 0.200000048 : f32
    %69 = vector.broadcast %cst_30 : f32 to vector<8x128xf32>
    %70 = arith.cmpf olt, %3, %69 : vector<8x128xf32>
    %71 = arith.andi %68, %70 : vector<8x128xi1>
    %72 = arith.extui %71 : vector<8x128xi1> to vector<8x128xi32>
    %73 = arith.sitofp %72 : vector<8x128xi32> to vector<8x128xf32>
    %cst_31 = arith.constant 0.200000048 : f32
    %74 = vector.broadcast %cst_31 : f32 to vector<8x128xf32>
    %75 = arith.cmpf oge, %3, %74 : vector<8x128xf32>
    %cst_32 = arith.constant 6.000000e-01 : f32
    %76 = vector.broadcast %cst_32 : f32 to vector<8x128xf32>
    %77 = arith.cmpf olt, %3, %76 : vector<8x128xf32>
    %78 = arith.andi %75, %77 : vector<8x128xi1>
    %79 = arith.extui %78 : vector<8x128xi1> to vector<8x128xi32>
    %80 = arith.sitofp %79 : vector<8x128xi32> to vector<8x128xf32>
    %cst_33 = arith.constant 6.000000e-01 : f32
    %81 = vector.broadcast %cst_33 : f32 to vector<8x128xf32>
    %82 = arith.cmpf oge, %3, %81 : vector<8x128xf32>
    %cst_34 = arith.constant 1.000000e+00 : f32
    %83 = vector.broadcast %cst_34 : f32 to vector<8x128xf32>
    %84 = arith.cmpf olt, %3, %83 : vector<8x128xf32>
    %85 = arith.andi %82, %84 : vector<8x128xi1>
    %86 = arith.extui %85 : vector<8x128xi1> to vector<8x128xi32>
    %87 = arith.sitofp %86 : vector<8x128xi32> to vector<8x128xf32>
    %cst_35 = arith.constant 1.000000e+00 : f32
    %88 = vector.broadcast %cst_35 : f32 to vector<8x128xf32>
    %89 = arith.cmpf oge, %3, %88 : vector<8x128xf32>
    %cst_36 = arith.constant 1.4000001 : f32
    %90 = vector.broadcast %cst_36 : f32 to vector<8x128xf32>
    %91 = arith.cmpf olt, %3, %90 : vector<8x128xf32>
    %92 = arith.andi %89, %91 : vector<8x128xi1>
    %93 = arith.extui %92 : vector<8x128xi1> to vector<8x128xi32>
    %94 = arith.sitofp %93 : vector<8x128xi32> to vector<8x128xf32>
    %cst_37 = arith.constant 1.4000001 : f32
    %95 = vector.broadcast %cst_37 : f32 to vector<8x128xf32>
    %96 = arith.cmpf oge, %3, %95 : vector<8x128xf32>
    %cst_38 = arith.constant 1.800000e+00 : f32
    %97 = vector.broadcast %cst_38 : f32 to vector<8x128xf32>
    %98 = arith.cmpf olt, %3, %97 : vector<8x128xf32>
    %99 = arith.andi %96, %98 : vector<8x128xi1>
    %100 = arith.extui %99 : vector<8x128xi1> to vector<8x128xi32>
    %101 = arith.sitofp %100 : vector<8x128xi32> to vector<8x128xf32>
    %cst_39 = arith.constant 1.800000e+00 : f32
    %102 = vector.broadcast %cst_39 : f32 to vector<8x128xf32>
    %103 = arith.cmpf oge, %3, %102 : vector<8x128xf32>
    %cst_40 = arith.constant 2.200000e+00 : f32
    %104 = vector.broadcast %cst_40 : f32 to vector<8x128xf32>
    %105 = arith.cmpf olt, %3, %104 : vector<8x128xf32>
    %106 = arith.andi %103, %105 : vector<8x128xi1>
    %107 = arith.extui %106 : vector<8x128xi1> to vector<8x128xi32>
    %108 = arith.sitofp %107 : vector<8x128xi32> to vector<8x128xf32>
    %109 = arith.mulf %9, %38 : vector<8x128xf32>
    %110 = arith.mulf %13, %45 : vector<8x128xf32>
    %111 = arith.subf %109, %110 : vector<8x128xf32>
    %cst_41 = arith.constant 2.500000e+00 : f32
    %112 = vector.broadcast %cst_41 : f32 to vector<8x128xf32>
    %113 = arith.mulf %112, %111 : vector<8x128xf32>
    %114 = arith.mulf %11, %45 : vector<8x128xf32>
    %115 = arith.mulf %15, %52 : vector<8x128xf32>
    %116 = arith.subf %114, %115 : vector<8x128xf32>
    %cst_42 = arith.constant 2.500000e+00 : f32
    %117 = vector.broadcast %cst_42 : f32 to vector<8x128xf32>
    %118 = arith.mulf %117, %116 : vector<8x128xf32>
    %119 = arith.mulf %13, %52 : vector<8x128xf32>
    %120 = arith.mulf %17, %59 : vector<8x128xf32>
    %121 = arith.subf %119, %120 : vector<8x128xf32>
    %cst_43 = arith.constant 2.500000e+00 : f32
    %122 = vector.broadcast %cst_43 : f32 to vector<8x128xf32>
    %123 = arith.mulf %122, %121 : vector<8x128xf32>
    %124 = arith.mulf %15, %59 : vector<8x128xf32>
    %125 = arith.mulf %19, %66 : vector<8x128xf32>
    %126 = arith.subf %124, %125 : vector<8x128xf32>
    %cst_44 = arith.constant 2.500000e+00 : f32
    %127 = vector.broadcast %cst_44 : f32 to vector<8x128xf32>
    %128 = arith.mulf %127, %126 : vector<8x128xf32>
    %129 = arith.mulf %17, %66 : vector<8x128xf32>
    %130 = arith.mulf %21, %73 : vector<8x128xf32>
    %131 = arith.subf %129, %130 : vector<8x128xf32>
    %cst_45 = arith.constant 2.500000e+00 : f32
    %132 = vector.broadcast %cst_45 : f32 to vector<8x128xf32>
    %133 = arith.mulf %132, %131 : vector<8x128xf32>
    %134 = arith.mulf %19, %73 : vector<8x128xf32>
    %135 = arith.mulf %23, %80 : vector<8x128xf32>
    %136 = arith.subf %134, %135 : vector<8x128xf32>
    %cst_46 = arith.constant 2.500000e+00 : f32
    %137 = vector.broadcast %cst_46 : f32 to vector<8x128xf32>
    %138 = arith.mulf %137, %136 : vector<8x128xf32>
    %139 = arith.mulf %21, %80 : vector<8x128xf32>
    %140 = arith.mulf %25, %87 : vector<8x128xf32>
    %141 = arith.subf %139, %140 : vector<8x128xf32>
    %cst_47 = arith.constant 2.500000e+00 : f32
    %142 = vector.broadcast %cst_47 : f32 to vector<8x128xf32>
    %143 = arith.mulf %142, %141 : vector<8x128xf32>
    %144 = arith.mulf %23, %87 : vector<8x128xf32>
    %145 = arith.mulf %27, %94 : vector<8x128xf32>
    %146 = arith.subf %144, %145 : vector<8x128xf32>
    %cst_48 = arith.constant 2.500000e+00 : f32
    %147 = vector.broadcast %cst_48 : f32 to vector<8x128xf32>
    %148 = arith.mulf %147, %146 : vector<8x128xf32>
    %149 = arith.mulf %25, %94 : vector<8x128xf32>
    %150 = arith.mulf %29, %101 : vector<8x128xf32>
    %151 = arith.subf %149, %150 : vector<8x128xf32>
    %cst_49 = arith.constant 2.500000e+00 : f32
    %152 = vector.broadcast %cst_49 : f32 to vector<8x128xf32>
    %153 = arith.mulf %152, %151 : vector<8x128xf32>
    %154 = arith.mulf %27, %101 : vector<8x128xf32>
    %155 = arith.mulf %31, %108 : vector<8x128xf32>
    %156 = arith.subf %154, %155 : vector<8x128xf32>
    %cst_50 = arith.constant 2.500000e+00 : f32
    %157 = vector.broadcast %cst_50 : f32 to vector<8x128xf32>
    %158 = arith.mulf %157, %156 : vector<8x128xf32>
    %159 = arith.mulf %9, %113 : vector<8x128xf32>
    %160 = arith.mulf %15, %118 : vector<8x128xf32>
    %161 = arith.subf %159, %160 : vector<8x128xf32>
    %cst_51 = arith.constant 1.250000e+00 : f32
    %162 = vector.broadcast %cst_51 : f32 to vector<8x128xf32>
    %163 = arith.mulf %162, %161 : vector<8x128xf32>
    %164 = arith.mulf %11, %118 : vector<8x128xf32>
    %165 = arith.mulf %17, %123 : vector<8x128xf32>
    %166 = arith.subf %164, %165 : vector<8x128xf32>
    %cst_52 = arith.constant 1.250000e+00 : f32
    %167 = vector.broadcast %cst_52 : f32 to vector<8x128xf32>
    %168 = arith.mulf %167, %166 : vector<8x128xf32>
    %169 = arith.mulf %13, %123 : vector<8x128xf32>
    %170 = arith.mulf %19, %128 : vector<8x128xf32>
    %171 = arith.subf %169, %170 : vector<8x128xf32>
    %cst_53 = arith.constant 1.250000e+00 : f32
    %172 = vector.broadcast %cst_53 : f32 to vector<8x128xf32>
    %173 = arith.mulf %172, %171 : vector<8x128xf32>
    %174 = arith.mulf %15, %128 : vector<8x128xf32>
    %175 = arith.mulf %21, %133 : vector<8x128xf32>
    %176 = arith.subf %174, %175 : vector<8x128xf32>
    %cst_54 = arith.constant 1.250000e+00 : f32
    %177 = vector.broadcast %cst_54 : f32 to vector<8x128xf32>
    %178 = arith.mulf %177, %176 : vector<8x128xf32>
    %179 = arith.mulf %17, %133 : vector<8x128xf32>
    %180 = arith.mulf %23, %138 : vector<8x128xf32>
    %181 = arith.subf %179, %180 : vector<8x128xf32>
    %cst_55 = arith.constant 1.250000e+00 : f32
    %182 = vector.broadcast %cst_55 : f32 to vector<8x128xf32>
    %183 = arith.mulf %182, %181 : vector<8x128xf32>
    %184 = arith.mulf %19, %138 : vector<8x128xf32>
    %185 = arith.mulf %25, %143 : vector<8x128xf32>
    %186 = arith.subf %184, %185 : vector<8x128xf32>
    %cst_56 = arith.constant 1.250000e+00 : f32
    %187 = vector.broadcast %cst_56 : f32 to vector<8x128xf32>
    %188 = arith.mulf %187, %186 : vector<8x128xf32>
    %189 = arith.mulf %21, %143 : vector<8x128xf32>
    %190 = arith.mulf %27, %148 : vector<8x128xf32>
    %191 = arith.subf %189, %190 : vector<8x128xf32>
    %cst_57 = arith.constant 1.250000e+00 : f32
    %192 = vector.broadcast %cst_57 : f32 to vector<8x128xf32>
    %193 = arith.mulf %192, %191 : vector<8x128xf32>
    %194 = arith.mulf %23, %148 : vector<8x128xf32>
    %195 = arith.mulf %29, %153 : vector<8x128xf32>
    %196 = arith.subf %194, %195 : vector<8x128xf32>
    %cst_58 = arith.constant 1.250000e+00 : f32
    %197 = vector.broadcast %cst_58 : f32 to vector<8x128xf32>
    %198 = arith.mulf %197, %196 : vector<8x128xf32>
    %199 = arith.mulf %25, %153 : vector<8x128xf32>
    %200 = arith.mulf %31, %158 : vector<8x128xf32>
    %201 = arith.subf %199, %200 : vector<8x128xf32>
    %cst_59 = arith.constant 1.250000e+00 : f32
    %202 = vector.broadcast %cst_59 : f32 to vector<8x128xf32>
    %203 = arith.mulf %202, %201 : vector<8x128xf32>
    %204 = arith.mulf %9, %163 : vector<8x128xf32>
    %205 = arith.mulf %17, %168 : vector<8x128xf32>
    %206 = arith.subf %204, %205 : vector<8x128xf32>
    %cst_60 = arith.constant 0.833333313 : f32
    %207 = vector.broadcast %cst_60 : f32 to vector<8x128xf32>
    %208 = arith.mulf %207, %206 : vector<8x128xf32>
    %209 = arith.mulf %11, %168 : vector<8x128xf32>
    %210 = arith.mulf %19, %173 : vector<8x128xf32>
    %211 = arith.subf %209, %210 : vector<8x128xf32>
    %cst_61 = arith.constant 0.833333313 : f32
    %212 = vector.broadcast %cst_61 : f32 to vector<8x128xf32>
    %213 = arith.mulf %212, %211 : vector<8x128xf32>
    %214 = arith.mulf %13, %173 : vector<8x128xf32>
    %215 = arith.mulf %21, %178 : vector<8x128xf32>
    %216 = arith.subf %214, %215 : vector<8x128xf32>
    %cst_62 = arith.constant 0.833333313 : f32
    %217 = vector.broadcast %cst_62 : f32 to vector<8x128xf32>
    %218 = arith.mulf %217, %216 : vector<8x128xf32>
    %219 = arith.mulf %15, %178 : vector<8x128xf32>
    %220 = arith.mulf %23, %183 : vector<8x128xf32>
    %221 = arith.subf %219, %220 : vector<8x128xf32>
    %cst_63 = arith.constant 0.833333313 : f32
    %222 = vector.broadcast %cst_63 : f32 to vector<8x128xf32>
    %223 = arith.mulf %222, %221 : vector<8x128xf32>
    %224 = arith.mulf %17, %183 : vector<8x128xf32>
    %225 = arith.mulf %25, %188 : vector<8x128xf32>
    %226 = arith.subf %224, %225 : vector<8x128xf32>
    %cst_64 = arith.constant 0.833333313 : f32
    %227 = vector.broadcast %cst_64 : f32 to vector<8x128xf32>
    %228 = arith.mulf %227, %226 : vector<8x128xf32>
    %229 = arith.mulf %19, %188 : vector<8x128xf32>
    %230 = arith.mulf %27, %193 : vector<8x128xf32>
    %231 = arith.subf %229, %230 : vector<8x128xf32>
    %cst_65 = arith.constant 0.833333313 : f32
    %232 = vector.broadcast %cst_65 : f32 to vector<8x128xf32>
    %233 = arith.mulf %232, %231 : vector<8x128xf32>
    %234 = arith.mulf %21, %193 : vector<8x128xf32>
    %235 = arith.mulf %29, %198 : vector<8x128xf32>
    %236 = arith.subf %234, %235 : vector<8x128xf32>
    %cst_66 = arith.constant 0.833333313 : f32
    %237 = vector.broadcast %cst_66 : f32 to vector<8x128xf32>
    %238 = arith.mulf %237, %236 : vector<8x128xf32>
    %239 = arith.mulf %23, %198 : vector<8x128xf32>
    %240 = arith.mulf %31, %203 : vector<8x128xf32>
    %241 = arith.subf %239, %240 : vector<8x128xf32>
    %cst_67 = arith.constant 0.833333313 : f32
    %242 = vector.broadcast %cst_67 : f32 to vector<8x128xf32>
    %243 = arith.mulf %242, %241 : vector<8x128xf32>
    %244 = tpu.concatenate %208, %213, %218, %223, %228, %233, %238, %243 in 1 : vector<8x128xf32>, vector<8x128xf32>, vector<8x128xf32>, vector<8x128xf32>, vector<8x128xf32>, vector<8x128xf32>, vector<8x128xf32>, vector<8x128xf32> -> vector<8x1024xf32>
    %cst_68 = arith.constant 0.000000e+00 : f32
    %245 = vector.broadcast %cst_68 : f32 to vector<8x128xf32>
    %246 = arith.subf %245, %3 : vector<8x128xf32>
    %247 = math.exp %246 : vector<8x128xf32>
    %cst_69 = arith.constant 1.000000e+00 : f32
    %248 = vector.broadcast %cst_69 : f32 to vector<8x128xf32>
    %249 = arith.addf %248, %247 : vector<8x128xf32>
    %250 = tpu.reciprocal %249 : vector<8x128xf32> -> vector<8x128xf32>
    %251 = arith.mulf %3, %250 : vector<8x128xf32>
    %cst_70 = arith.constant dense<0.000000e+00> : vector<8x128xf32>
    %252 = tpu.matmul %251, %5, %cst_70 {dimension_numbers = #tpu.dot_dimension_numbers<[1], [0], [0], [1], [0, 0, 1, 1], [], []>} : vector<8x128xf32>, vector<128x128xf32>, vector<8x128xf32> -> vector<8x128xf32>
    %cst_71 = arith.constant dense<0.000000e+00> : vector<8x128xf32>
    %253 = tpu.matmul %244, %7, %cst_71 {dimension_numbers = #tpu.dot_dimension_numbers<[1], [0], [0], [1], [0, 0, 1, 1], [], []>} : vector<8x1024xf32>, vector<1024x128xf32>, vector<8x128xf32> -> vector<8x128xf32>
    %254 = arith.addf %252, %253 : vector<8x128xf32>
    %c0_72 = arith.constant 0 : index
    %c0_73 = arith.constant 0 : index
    %255 = vector.load %arg7[%c0_72, %c0_73] : memref<8x128xf32, #tpu.memory_space<vmem>>, vector<8x128xf32>
    tpu.vector_store %arg7[%c0_72, %c0_73], %254 {strides = array<i32>} : memref<8x128xf32, #tpu.memory_space<vmem>>, vector<8x128xf32>,
    %c3_i32 = arith.constant 3 : i32
    %256 = arith.cmpi eq, %arg1, %c3_i32 : i32
    %257 = arith.extui %256 : i1 to i32
    %c0_i32_74 = arith.constant 0 : i32
    %258 = arith.cmpi ne, %257, %c0_i32_74 : i32
    scf.if %258 {
      %c0_75 = arith.constant 0 : index
      %c0_76 = arith.constant 0 : index
      %259 = vector.load %arg7[%c0_75, %c0_76] : memref<8x128xf32, #tpu.memory_space<vmem>>, vector<8x128xf32>
      %c0_77 = arith.constant 0 : index
      %c0_78 = arith.constant 0 : index
      %260 = vector.load %arg5[%c0_77, %c0_78] : memref<1x128xf32, #tpu.memory_space<vmem>>, vector<1x128xf32>
      %261 = vector.broadcast %260 : vector<1x128xf32> to vector<8x128xf32>
      %262 = arith.addf %259, %261 : vector<8x128xf32>
      %c0_79 = arith.constant 0 : index
      %c0_80 = arith.constant 0 : index
      %263 = vector.load %arg6[%c0_79, %c0_80] : memref<8x128xf32, #tpu.memory_space<vmem>>, vector<8x128xf32>
      tpu.vector_store %arg6[%c0_79, %c0_80], %262 {strides = array<i32>} : memref<8x128xf32, #tpu.memory_space<vmem>>, vector<8x128xf32>,
    } else {
    }
    return
  }
  func.func @transform_0(%arg0: i32, %arg1: i32) -> (i32, i32) {
    %c0_i32 = arith.constant 0 : i32
    %c0_i32_0 = arith.constant 0 : i32
    return %arg0, %c0_i32 : i32, i32
  }
  func.func @transform_1(%arg0: i32, %arg1: i32) -> (i32, i32, i32) {
    %c0_i32 = arith.constant 0 : i32
    %c0_i32_0 = arith.constant 0 : i32
    %c0_i32_1 = arith.constant 0 : i32
    return %arg1, %c0_i32, %c0_i32_0 : i32, i32, i32
  }
  func.func @transform_2(%arg0: i32, %arg1: i32) -> (i32, i32, i32) {
    %c0_i32 = arith.constant 0 : i32
    %c0_i32_0 = arith.constant 0 : i32
    %c0_i32_1 = arith.constant 0 : i32
    return %arg1, %c0_i32, %c0_i32_0 : i32, i32, i32
  }
  func.func @transform_3(%arg0: i32, %arg1: i32) -> (i32, i32) {
    %c0_i32 = arith.constant 0 : i32
    %c0_i32_0 = arith.constant 0 : i32
    %c0_i32_1 = arith.constant 0 : i32
    return %c0_i32, %c0_i32_0 : i32, i32
  }
  func.func @transform_4(%arg0: i32, %arg1: i32) -> (i32, i32) {
    %c0_i32 = arith.constant 0 : i32
    %c0_i32_0 = arith.constant 0 : i32
    return %arg0, %c0_i32 : i32, i32
  }
}

</mosaic_0001>

<bundles_post_ra>
// kernel: tpu_custom_call.1
= control target key start
LH: loop header
LB: loop body
LE: loop exit
PB: predicated region body
PF: predicated region fallthrough
CT: control target
= control target key end

     0   :  { %9 = vsyncpa [#allocation4], 0  ;;  %s1791_s0 = inlined_call_operand.hbm [shape: f32[8,128], index: 0, kind: input, shape index: {}]   ;;  %s1792_s1 = inlined_call_operand.hbm [shape: f32[4,128,128], index: 1, kind: input, shape index: {}]   ;;  %s1793_s2 = inlined_call_operand.hbm [shape: f32[4,1024,128], index: 2, kind: input, shape index: {}]   ;;  %s1794_s3 = inlined_call_operand.hbm [shape: f32[1,128], index: 3, kind: input, shape index: {}]   ;;  %s1795_s4 = inlined_call_operand.hbm [shape: f32[8,128], index: 4, kind: output, shape index: {}]  }
   0x1   :  { %10 = vsyncpa [#allocation7], 0 }
   0x2   :  { %12 = vsyncpa [#allocation7 + $0x1], 0 }
   0x3   :  { %13 = vsyncpa [#allocation10], 0 }
   0x4   :  { %14 = vsyncpa [#allocation5], 0  ;;  %s1338_s15 = smov 0   ;;  %s1340_s16 = smov 0  }
   0x5   :  { %s1342_s17 = smov 0   ;;  %s1344_s18 = smov 0  }
   0x6   :  { %s1346_s19 = smov 0   ;;  %s1348_s20 = smov 0  }
   0x7 LB: > { %s29_s21 = sadd.s32 1, %s1301_s19  ;;  %s65_s22 = sadd.s32 1, %s1293_s17  ;;  %s1305_s20 = sphi %s1348_s20, %s20_s20   ;;  %s1301_s19 = sphi %s1346_s19, %s1804_s19   ;;  %s1297_s18 = sphi %s1344_s18, %s1803_s18   ;;  %s1293_s17 = sphi %s1342_s17, %s1802_s17   ;;  %s1289_s16 = sphi %s1340_s16, %s1801_s16   ;;  %s1285_s15 = sphi %s1338_s15, %s1800_s15  }
   0x8   : > { %p30_p0 = scmp.ge.s32.totalorder %s29_s21, 4  ;;  %p72_p1 = scmp.ne.s32.totalorder %s1293_s17, %s1289_s16 }
   0x9   : > { %p73_p2 = scmp.eq.s32.totalorder %s1305_s20, 0  ;;  %p1031_p4 = scmp.lt.s32.totalorder %s1305_s20, 4 }
   0xa   : > { %s1806_s21 = smov (%p30_p0, %s29_s21), 0  ;;  %s201_s25 = sand.u32 1, %s1305_s20  }
   0xb   : > { %p1375_p3 = por %p73_p2, %p72_p1  ;;  %s62_s24 = ssub.s32 %s1301_s19, %s1806_s21 }
   0xc   : > { %p63_p5 = scmp.eq.s32.totalorder %s62_s24, 0  ;;  %s203_s26 = sand.u32 1, %s1293_s17  }
   0xd   : > { %s997_s27 = sshll.u32 %s1301_s19, 7  ;;  %s957_s29 = sshll.u32 %s203_s26, 7 }
   0xe   : > { %s1386_s28 = scalar_select %p63_p5, %s1293_s17, %s65_s22  }
   0xf   : > { %s210_s6 = scalar_lea.hbm %s1792_s1, %s997_s27  ;;  %s205_s8 = scalar_lea.vmem [#allocation6], %s957_s29 }
  0x10   : > { %s211_s7 = sshll.u32 %s210_s6, 4  ;;  %s213_s9 = sshll.u32 %s205_s8, 4  ;;  %s212_s7 = int_to_ptr.hbm [resolvable:$true] %s211_s7  ;;  %s214_s9 = int_to_ptr.vmem [resolvable:$true] %s213_s9 }
  0x11   : > { %p1395_p6 = pnand %p1031_p4, %p1375_p3  ;;  %s960_s11 = sshll.u32 %s203_s26, 10 }
  0x12   : > { %s1399_s12 = scalar_lea.sflag [#allocation7], %s201_s25  ;;  %s1307_s13 = smov 128  }
  0x13   : > { %s1308_s14 = smov 8   ;;  %s227_s22 = scalar_lea.vmem [#allocation8], %s960_s11 }
  0x14   : > { %1025 = dma.hbm_to_vmem [thread:$0]  (!%p1395_p6), %s212_s7, 2048, %s214_s9, %s1399_s12, %s1307_s13, %s1307_s13, %s1308_s14  }
  0x15   : > { %s1407_s24 = sshll.u32 %s227_s22, 4  ;;  %s1410_s23 = sadd.s32 4294967295, %s1305_s20   ;;  %s236_s24 = int_to_ptr.vmem [resolvable:$true] %s1407_s24 }
  0x16   : > { %p78_p7 = scmp.ne.s32.totalorder %s1289_s16, %s1285_s15  ;;  %p79_p8 = scmp.eq.s32.totalorder %s1410_s23, 0 }
  0x17   : > { %p953_p9 = scmp.ge.s32.totalorder %s1305_s20, 1  ;;  %p162_p10 = scmp.lt.s32.totalorder %s1305_s20, 5 }
  0x18   : > { %p1419_p11 = por %p79_p8, %p78_p7  ;;  %s176_s29 = sshll.u32 %s1791_s0, 4  ;;  %s177_s29 = int_to_ptr.hbm [resolvable:$true] %s176_s29 }
  0x19   : > { %p1426_p12 = pnand %p953_p9, %p162_p10  ;;  %s188_s6 = sshll.u32 %s1794_s3, 4  ;;  %s189_s6 = int_to_ptr.hbm [resolvable:$true] %s188_s6 }
  0x1a   : > { %s1309_s7 = smov [#allocation3]   ;;  %s1310_s9 = smov [#allocation9]  }
  0x1b   : > { %p1015_p13 = pneg %p1426_p12  ;;  %s178_s8 = sshll.u32 %s1309_s7, 4  ;;  %s179_s8 = int_to_ptr.vmem [resolvable:$true] %s178_s8 }
  0x1c   : > { %s190_s11 = sshll.u32 %s1310_s9, 4  ;;  %s998_s22 = sshll.u32 %s1301_s19, 10  ;;  %s191_s11 = int_to_ptr.vmem [resolvable:$true] %s190_s11 }
  0x1d   : > { %p1016_p0 = pnand %p1015_p13, %p79_p8  ;;  %s232_s15 = scalar_lea.hbm %s1793_s2, %s998_s22 }
  0x1e   : > { %s233_s5 = sshll.u32 %s232_s15, 4  ;;  %247 = sbr.rel (%p1426_p12) target bundleno = 295 (0x127), region = 36  ;;  %s234_s5 = int_to_ptr.hbm [resolvable:$true] %s233_s5 }
  0x1f   : > { %1018 = dma.hbm_to_vmem [thread:$0]  (!%p1016_p0), %s177_s29, 128, %s179_s8, [#allocation4]  }
  0x20   : > { %1021 = dma.hbm_to_vmem [thread:$0]  (!%p1016_p0), %s189_s6, 16, %s191_s11, [#allocation10]  }
  0x21   : > { %1028 = dma.hbm_to_vmem [thread:$0]  (!%p1395_p6), %s234_s5, 16384, %s236_s24, %s1399_s12, %s1307_s13, %s1307_s13, %s1308_s14  }
  0x23   : > { %1268 = dma.done.wait (%p79_p8), [#allocation4], 128  }
  0x24   : > { %1270 = vsyncadd (%p79_p8), [#allocation4], 4294967168  ;;  %s254_s29 = sand.u32 1, %s1410_s23   ;;  %s256_s6 = sand.u32 1, %s1289_s16  }
  0x25   : > { %s965_s7 = sshll.u32 %s256_s6, 7  ;;  %s255_s10 = scalar_lea.sflag [#allocation7], %s254_s29 }
  0x26   : > { %s1456_s8 = scalar_lea.vmem [#allocation6], %s965_s7 }
  0x27   : > { %1272 = dma.done.wait (%p1419_p11), %s255_s10, 18432  }
  0x28   : > { %1274 = vsyncadd (%p1419_p11), %s255_s10, 4294948864  ;;  %s966_s12 = sshll.u32 %s256_s6, 10 }
  0x29   : > { %s1462_s13 = scalar_lea.vmem [#allocation8], %s966_s12 }
  0x2a   : > { %1276 = dma.done.wait (%p79_p8), [#allocation10], 16  }
  0x2b   : > { %1278 = vsyncadd (%p79_p8), [#allocation10], 4294967280  ;;  %p968_p1 = scmp.ne.s32.totalorder %s1297_s18, 0 }
  0x2d   : > { %302 = sbr.rel (%p968_p1) target bundleno = 52 (0x34), region = 56 }
  0x32   : > { %v303_v0 = vld [vmem:[#allocation3] sm:$0xff] }
  0x33   : > { %304 = vst [vmem:[#allocation2] sm:$0xff] %v303_v0 }
  0x34 PF: > { %v337_v1 = vld [vmem:[%s1462_s13 + $0x78] sm:$0xff]  ;;  %v336_v2 = vld [vmem:[%s1462_s13 + $0x70] sm:$0xff]  ;;  %v335_v5 = vld [vmem:[%s1462_s13 + $0x68] sm:$0xff]  ;;  %p992_p2 = scmp.ne.s32.totalorder %s1297_s18, 3 }
  0x35   : > { %644 = vmatpush.msra.mxu0 %v337_v1  ;;  %v369_v3 = vld [vmem:[%s1462_s13 + $0x178] sm:$0xff]  ;;  %v368_v4 = vld [vmem:[%s1462_s13 + $0x170] sm:$0xff]  ;;  %v367_v8 = vld [vmem:[%s1462_s13 + $0x168] sm:$0xff] }
  0x36   : > { %684 = vmatpush.msra.mxu2 %v369_v3  ;;  %v385_v6 = vld [vmem:[%s1462_s13 + $0x1f8] sm:$0xff]  ;;  %v384_v9 = vld [vmem:[%s1462_s13 + $0x1f0] sm:$0xff]  ;;  %v334_v10 = vld [vmem:[%s1462_s13 + $0x60] sm:$0xff] }
  0x37   : > { %v353_v7 = vld [vmem:[%s1462_s13 + $0xf8] sm:$0xff]  ;;  %645 = vmatpush.msra.mxu0 %v336_v2  ;;  %704 = vmatpush.msra.mxu3 %v385_v6  ;;  %v352_v11 = vld [vmem:[%s1462_s13 + $0xf0] sm:$0xff]  ;;  %v383_v12 = vld [vmem:[%s1462_s13 + $0x1e8] sm:$0xff] }
  0x38   : > { %685 = vmatpush.msra.mxu2 %v368_v4  ;;  %664 = vmatpush.msra.mxu1 %v353_v7  ;;  %v366_v13 = vld [vmem:[%s1462_s13 + $0x160] sm:$0xff]  ;;  %v351_v14 = vld [vmem:[%s1462_s13 + $0xe8] sm:$0xff]  ;;  %v333_v15 = vld [vmem:[%s1462_s13 + $0x58] sm:$0xff] }
  0x39   : > { %646 = vmatpush.msra.mxu0 %v335_v5  ;;  %705 = vmatpush.msra.mxu3 %v384_v9  ;;  %v382_v16 = vld [vmem:[%s1462_s13 + $0x1e0] sm:$0xff]  ;;  %v365_v17 = vld [vmem:[%s1462_s13 + $0x158] sm:$0xff]  ;;  %v332_v19 = vld [vmem:[%s1462_s13 + $0x50] sm:$0xff] }
  0x3a   : > { %686 = vmatpush.msra.mxu2 %v367_v8  ;;  %665 = vmatpush.msra.mxu1 %v352_v11  ;;  %v350_v18 = vld [vmem:[%s1462_s13 + $0xe0] sm:$0xff]  ;;  %v381_v20 = vld [vmem:[%s1462_s13 + $0x1d8] sm:$0xff]  ;;  %v364_v21 = vld [vmem:[%s1462_s13 + $0x150] sm:$0xff] }
  0x3b   : > { %647 = vmatpush.msra.mxu0 %v334_v10  ;;  %706 = vmatpush.msra.mxu3 %v383_v12  ;;  %v349_v22 = vld [vmem:[%s1462_s13 + $0xd8] sm:$0xff]  ;;  %v331_v23 = vld [vmem:[%s1462_s13 + $0x48] sm:$0xff]  ;;  %v380_v24 = vld [vmem:[%s1462_s13 + $0x1d0] sm:$0xff] }
  0x3c   : > { %687 = vmatpush.msra.mxu2 %v366_v13  ;;  %666 = vmatpush.msra.mxu1 %v351_v14  ;;  %v363_v25 = vld [vmem:[%s1462_s13 + $0x148] sm:$0xff]  ;;  %v348_v26 = vld [vmem:[%s1462_s13 + $0xd0] sm:$0xff]  ;;  %v330_v27 = vld [vmem:[%s1462_s13 + $0x40] sm:$0xff] }
  0x3d   : > { %648 = vmatpush.msra.mxu0 %v333_v15  ;;  %707 = vmatpush.msra.mxu3 %v382_v16  ;;  %v379_v28 = vld [vmem:[%s1462_s13 + $0x1c8] sm:$0xff]  ;;  %v362_v29 = vld [vmem:[%s1462_s13 + $0x140] sm:$0xff]  ;;  %v329_v31 = vld [vmem:[%s1462_s13 + $0x38] sm:$0xff] }
  0x3e   : > { %688 = vmatpush.msra.mxu2 %v365_v17  ;;  %667 = vmatpush.msra.mxu1 %v350_v18  ;;  %v347_v30 = vld [vmem:[%s1462_s13 + $0xc8] sm:$0xff]  ;;  %v378_v32 = vld [vmem:[%s1462_s13 + $0x1c0] sm:$0xff]  ;;  %v361_v33 = vld [vmem:[%s1462_s13 + $0x138] sm:$0xff] }
  0x3f   : > { %649 = vmatpush.msra.mxu0 %v332_v19  ;;  %708 = vmatpush.msra.mxu3 %v381_v20  ;;  %v346_v34 = vld [vmem:[%s1462_s13 + $0xc0] sm:$0xff]  ;;  %v328_v35 = vld [vmem:[%s1462_s13 + $0x30] sm:$0xff]  ;;  %v377_v36 = vld [vmem:[%s1462_s13 + $0x1b8] sm:$0xff] }
  0x40   : > { %689 = vmatpush.msra.mxu2 %v364_v21  ;;  %668 = vmatpush.msra.mxu1 %v349_v22  ;;  %v360_v37 = vld [vmem:[%s1462_s13 + $0x130] sm:$0xff]  ;;  %v345_v38 = vld [vmem:[%s1462_s13 + $0xb8] sm:$0xff]  ;;  %v327_v39 = vld [vmem:[%s1462_s13 + $0x28] sm:$0xff] }
  0x41   : > { %650 = vmatpush.msra.mxu0 %v331_v23  ;;  %709 = vmatpush.msra.mxu3 %v380_v24  ;;  %v376_v40 = vld [vmem:[%s1462_s13 + $0x1b0] sm:$0xff]  ;;  %v359_v41 = vld [vmem:[%s1462_s13 + $0x128] sm:$0xff]  ;;  %v326_v43 = vld [vmem:[%s1462_s13 + $0x20] sm:$0xff] }
  0x42   : > { %690 = vmatpush.msra.mxu2 %v363_v25  ;;  %669 = vmatpush.msra.mxu1 %v348_v26  ;;  %v344_v42 = vld [vmem:[%s1462_s13 + $0xb0] sm:$0xff]  ;;  %v375_v44 = vld [vmem:[%s1462_s13 + $0x1a8] sm:$0xff]  ;;  %v358_v45 = vld [vmem:[%s1462_s13 + $0x120] sm:$0xff] }
  0x43   : > { %651 = vmatpush.msra.mxu0 %v330_v27  ;;  %710 = vmatpush.msra.mxu3 %v379_v28  ;;  %v343_v46 = vld [vmem:[%s1462_s13 + $0xa8] sm:$0xff]  ;;  %v325_v47 = vld [vmem:[%s1462_s13 + $0x18] sm:$0xff]  ;;  %v374_v48 = vld [vmem:[%s1462_s13 + $0x1a0] sm:$0xff] }
  0x44   : > { %691 = vmatpush.msra.mxu2 %v362_v29  ;;  %670 = vmatpush.msra.mxu1 %v347_v30  ;;  %v357_v49 = vld [vmem:[%s1462_s13 + $0x118] sm:$0xff]  ;;  %v342_v50 = vld [vmem:[%s1462_s13 + $0xa0] sm:$0xff]  ;;  %v324_v51 = vld [vmem:[%s1462_s13 + $0x10] sm:$0xff]  ;;  %v1311_v30 = vmov 0.0  }
  0x45   : > { %652 = vmatpush.msra.mxu0 %v329_v31  ;;  %711 = vmatpush.msra.mxu3 %v378_v32  ;;  %v373_v52 = vld [vmem:[%s1462_s13 + $0x198] sm:$0xff]  ;;  %v356_v53 = vld [vmem:[%s1462_s13 + $0x110] sm:$0xff]  ;;  %v323_v55 = vld [vmem:[%s1462_s13 + $0x8] sm:$0xff] }
  0x46   : > { %692 = vmatpush.msra.mxu2 %v361_v33  ;;  %671 = vmatpush.msra.mxu1 %v346_v34  ;;  %v341_v54 = vld [vmem:[%s1462_s13 + $0x98] sm:$0xff]  ;;  %v372_v56 = vld [vmem:[%s1462_s13 + $0x190] sm:$0xff]  ;;  %v355_v57 = vld [vmem:[%s1462_s13 + $0x108] sm:$0xff] }
  0x47   : > { %653 = vmatpush.msra.mxu0 %v328_v35  ;;  %712 = vmatpush.msra.mxu3 %v377_v36  ;;  %v340_v58 = vld [vmem:[%s1462_s13 + $0x90] sm:$0xff]  ;;  %v322_v59 = vld [vmem:[%s1462_s13] sm:$0xff]  ;;  %v371_v60 = vld [vmem:[%s1462_s13 + $0x188] sm:$0xff] }
  0x48   : > { %693 = vmatpush.msra.mxu2 %v360_v37  ;;  %672 = vmatpush.msra.mxu1 %v345_v38  ;;  %v401_v61 = vld [vmem:[%s1462_s13 + $0x278] sm:$0xff]  ;;  %v354_v62 = vld [vmem:[%s1462_s13 + $0x100] sm:$0xff]  ;;  %v339_v0 = vld [vmem:[%s1462_s13 + $0x88] sm:$0xff] }
  0x49   : > { %654 = vmatpush.msra.mxu0 %v327_v39  ;;  %713 = vmatpush.msra.mxu3 %v376_v40  ;;  %v433_v63 = vld [vmem:[%s1462_s13 + $0x378] sm:$0xff]  ;;  %v400_v1 = vld [vmem:[%s1462_s13 + $0x270] sm:$0xff]  ;;  %v370_v2 = vld [vmem:[%s1462_s13 + $0x180] sm:$0xff] }
  0x4a   : > { %694 = vmatpush.msra.mxu2 %v359_v41  ;;  %673 = vmatpush.msra.mxu1 %v344_v42  ;;  %v432_v3 = vld [vmem:[%s1462_s13 + $0x370] sm:$0xff]  ;;  %v449_v4 = vld [vmem:[%s1462_s13 + $0x3f8] sm:$0xff]  ;;  %v399_v5 = vld [vmem:[%s1462_s13 + $0x268] sm:$0xff] }
  0x4b   : > { %655 = vmatpush.msra.mxu0 %v326_v43  ;;  %714 = vmatpush.msra.mxu3 %v375_v44  ;;  %v338_v6 = vld [vmem:[%s1462_s13 + $0x80] sm:$0xff]  ;;  %v417_v8 = vld [vmem:[%s1462_s13 + $0x2f8] sm:$0xff]  ;;  %v431_v9 = vld [vmem:[%s1462_s13 + $0x368] sm:$0xff] }
  0x4c   : > { %695 = vmatpush.msra.mxu2 %v358_v45  ;;  %674 = vmatpush.msra.mxu1 %v343_v46  ;;  %v398_v7 = vld [vmem:[%s1462_s13 + $0x260] sm:$0xff]  ;;  %v397_v10 = vld [vmem:[%s1462_s13 + $0x258] sm:$0xff]  ;;  %v448_v11 = vld [vmem:[%s1462_s13 + $0x3f0] sm:$0xff] }
  0x4d   : > { %656 = vmatpush.msra.mxu0 %v325_v47  ;;  %715 = vmatpush.msra.mxu3 %v374_v48  ;;  %v416_v12 = vld [vmem:[%s1462_s13 + $0x2f0] sm:$0xff]  ;;  %v430_v13 = vld [vmem:[%s1462_s13 + $0x360] sm:$0xff]  ;;  %v447_v14 = vld [vmem:[%s1462_s13 + $0x3e8] sm:$0xff] }
  0x4e   : > { %696 = vmatpush.msra.mxu2 %v357_v49  ;;  %675 = vmatpush.msra.mxu1 %v342_v50  ;;  %v415_v15 = vld [vmem:[%s1462_s13 + $0x2e8] sm:$0xff]  ;;  %v396_v16 = vld [vmem:[%s1462_s13 + $0x250] sm:$0xff]  ;;  %v429_v17 = vld [vmem:[%s1462_s13 + $0x358] sm:$0xff] }
  0x4f   : > { %657 = vmatpush.msra.mxu0 %v324_v51  ;;  %716 = vmatpush.msra.mxu3 %v373_v52  ;;  %v446_v18 = vld [vmem:[%s1462_s13 + $0x3e0] sm:$0xff]  ;;  %v1551_v19 = vld [vmem:[#allocation2] sm:$0xff]  ;;  %v395_v25 = vld [vmem:[%s1462_s13 + $0x248] sm:$0xff] }
  0x50   : > { %697 = vmatpush.msra.mxu2 %v356_v53  ;;  %676 = vmatpush.msra.mxu1 %v341_v54  ;;  %v414_v20 = vld [vmem:[%s1462_s13 + $0x2e0] sm:$0xff]  ;;  %v428_v21 = vld [vmem:[%s1462_s13 + $0x350] sm:$0xff]  ;;  %v1556_v22 = vadd.f32 1.4, %v1551_v19  ;;  %v1559_v23 = vadd.f32 1.0, %v1551_v19  ;;  %vm473_vm0 = vcmp.lt.f32.partialorder %v1551_v19, -1.0 }
  0x51   : > { %658 = vmatpush.msra.mxu0 %v323_v55  ;;  %717 = vmatpush.msra.mxu3 %v372_v56  ;;  %v1562_v24 = vadd.f32 0.6, %v1551_v19  ;;  %v1567_v26 = vadd.f32 0.19999999, %v1551_v19  ;;  %v1570_v27 = vadd.f32 -0.20000005, %v1551_v19 }
  0x52   : > { %698 = vmatpush.msra.mxu2 %v355_v57  ;;  %677 = vmatpush.msra.mxu1 %v340_v58  ;;  %vm472_vm1 = vcmp.ge.f32.partialorder %v1551_v19, -1.4  ;;  %v445_v28 = vld [vmem:[%s1462_s13 + $0x3d8] sm:$0xff]  ;;  %vm477_vm3 = vcmp.ge.f32.partialorder %v1551_v19, -1.0  ;;  %vm478_vm4 = vcmp.lt.f32.partialorder %v1551_v19, -0.6 }
  0x53   : > { %659 = vmatpush.msra.mxu0 %v322_v59  ;;  %718 = vmatpush.msra.mxu3 %v371_v60  ;;  %vm474_vm2 = vmand %vm472_vm1, %vm473_vm0  ;;  %vm482_vm5 = vcmp.ge.f32.partialorder %v1551_v19, -0.6  ;;  %v413_v29 = vld [vmem:[%s1462_s13 + $0x2d8] sm:$0xff]  ;;  %vm483_vm7 = vcmp.lt.f32.partialorder %v1551_v19, -0.19999999  ;;  %v427_v32 = vld [vmem:[%s1462_s13 + $0x348] sm:$0xff] }
  0x54   : > { %699 = vmatpush.msra.mxu2 %v354_v62  ;;  %678 = vmatpush.msra.mxu1 %v339_v0  ;;  %v983_v31 = vsel %vm474_vm2, 1.0, %v1311_v30  ;;  %vm479_vm6 = vmand %vm477_vm3, %vm478_vm4  ;;  %vm487_vm8 = vcmp.ge.f32.partialorder %v1551_v19, -0.19999999  ;;  %vm488_vm10 = vcmp.lt.f32.partialorder %v1551_v19, 0.20000005  ;;  %v394_v36 = vld [vmem:[%s1462_s13 + $0x240] sm:$0xff] }
  0x55   : > { %724 = vmatpush.msrb.mxu0 %v401_v61  ;;  %719 = vmatpush.msra.mxu3 %v370_v2  ;;  %v984_v33 = vsel %vm479_vm6, 1.0, %v1311_v30  ;;  %vm484_vm9 = vmand %vm482_vm5, %vm483_vm7  ;;  %v525_v34 = vmul.f32 %v983_v31, %v1556_v22  ;;  %v1586_v35 = vadd.f32 2.2, %v1551_v19  ;;  %v444_v37 = vld [vmem:[%s1462_s13 + $0x3d0] sm:$0xff]  ;;  %v1594_v41 = vadd.f32 1.8, %v1551_v19 }
  0x56   : > { %764 = vmatpush.msrb.mxu2 %v433_v63  ;;  %679 = vmatpush.msra.mxu1 %v338_v6  ;;  %v985_v38 = vsel %vm484_vm9, 1.0, %v1311_v30  ;;  %vm489_vm11 = vmand %vm487_vm8, %vm488_vm10  ;;  %v526_v39 = vmul.f32 %v984_v33, %v1562_v24  ;;  %v529_v40 = vmul.f32 %v984_v33, %v1559_v23  ;;  %v412_v42 = vld [vmem:[%s1462_s13 + $0x2d0] sm:$0xff]  ;;  %v426_v43 = vld [vmem:[%s1462_s13 + $0x340] sm:$0xff]  ;;  %vm462_vm12 = vcmp.ge.f32.partialorder %v1551_v19, -2.2 }
  0x57   : > { %725 = vmatpush.msrb.mxu0 %v400_v1  ;;  %784 = vmatpush.msrb.mxu3 %v449_v4  ;;  %v1599_v44 = vsel %vm489_vm11, 1.0, %v1311_v30  ;;  %v530_v45 = vmul.f32 %v985_v38, %v1567_v26  ;;  %v533_v46 = vmul.f32 %v985_v38, %v1562_v24  ;;  %v393_v47 = vld [vmem:[%s1462_s13 + $0x238] sm:$0xff]  ;;  %v443_v48 = vld [vmem:[%s1462_s13 + $0x3c8] sm:$0xff]  ;;  %vm463_vm13 = vcmp.lt.f32.partialorder %v1551_v19, -1.8  ;;  %v392_v56 = vld [vmem:[%s1462_s13 + $0x230] sm:$0xff] }
  0x58   : > { %765 = vmatpush.msrb.mxu2 %v432_v3  ;;  %744 = vmatpush.msrb.mxu1 %v417_v8  ;;  %v527_v49 = vsub.f32 %v525_v34, %v526_v39  ;;  %v534_v50 = vmul.f32 %v1599_v44, %v1570_v27  ;;  %vm467_vm14 = vcmp.ge.f32.partialorder %v1551_v19, -1.8  ;;  %v411_v51 = vld [vmem:[%s1462_s13 + $0x2c8] sm:$0xff]  ;;  %v425_v52 = vld [vmem:[%s1462_s13 + $0x338] sm:$0xff]  ;;  %vm464_vm15 = vmand %vm462_vm12, %vm463_vm13  ;;  %vm468_vm0 = vcmp.lt.f32.partialorder %v1551_v19, -1.4 }
  0x59   : > { %726 = vmatpush.msrb.mxu0 %v399_v5  ;;  %785 = vmatpush.msrb.mxu3 %v448_v11  ;;  %v531_v53 = vsub.f32 %v529_v40, %v530_v45  ;;  %v522_v54 = vmul.f32 %v983_v31, %v1559_v23  ;;  %v1615_v55 = vadd.f32 -0.6, %v1551_v19  ;;  %v442_v57 = vld [vmem:[%s1462_s13 + $0x3c0] sm:$0xff]  ;;  %v981_v60 = vsel %vm464_vm15, 1.0, %v1311_v30  ;;  %vm469_vm1 = vmand %vm467_vm14, %vm468_vm0  ;;  %v424_v62 = vld [vmem:[%s1462_s13 + $0x330] sm:$0xff] }
  0x5a   : > { %766 = vmatpush.msrb.mxu2 %v431_v9  ;;  %745 = vmatpush.msrb.mxu1 %v416_v12  ;;  %v528_v58 = vmul.f32 2.5, %v527_v49  ;;  %v535_v59 = vsub.f32 %v533_v46, %v534_v50  ;;  %vm492_vm2 = vcmp.ge.f32.partialorder %v1551_v19, 0.20000005  ;;  %v410_v61 = vld [vmem:[%s1462_s13 + $0x2c0] sm:$0xff]  ;;  %v982_v0 = vsel %vm469_vm1, 1.0, %v1311_v30  ;;  %v391_v2 = vld [vmem:[%s1462_s13 + $0x228] sm:$0xff] }
  0x5b   : > { %727 = vmatpush.msrb.mxu0 %v398_v7  ;;  %786 = vmatpush.msrb.mxu3 %v447_v14  ;;  %v532_v63 = vmul.f32 2.5, %v531_v53  ;;  %v517_v1 = vmul.f32 %v981_v60, %v1586_v35  ;;  %vm493_vm3 = vcmp.lt.f32.partialorder %v1551_v19, 0.6  ;;  %v441_v3 = vld [vmem:[%s1462_s13 + $0x3b8] sm:$0xff]  ;;  %v518_v6 = vmul.f32 %v982_v0, %v1556_v22  ;;  %v423_v9 = vld [vmem:[%s1462_s13 + $0x328] sm:$0xff]  ;;  %v390_v14 = vld [vmem:[%s1462_s13 + $0x220] sm:$0xff] }
  0x5c   : > { %767 = vmatpush.msrb.mxu2 %v430_v13  ;;  %746 = vmatpush.msrb.mxu1 %v415_v15  ;;  %v536_v4 = vmul.f32 2.5, %v535_v59  ;;  %v565_v5 = vmul.f32 %v1556_v22, %v528_v58  ;;  %v521_v7 = vmul.f32 %v982_v0, %v1594_v41  ;;  %vm494_vm4 = vmand %vm492_vm2, %vm493_vm3  ;;  %v409_v8 = vld [vmem:[%s1462_s13 + $0x2b8] sm:$0xff]  ;;  %v1640_v12 = vmul.f32 %v1562_v24, %v528_v58  ;;  %v440_v15 = vld [vmem:[%s1462_s13 + $0x3b0] sm:$0xff] }
  0x5d   : > { %728 = vmatpush.msrb.mxu0 %v397_v10  ;;  %787 = vmatpush.msrb.mxu3 %v446_v18  ;;  %v566_v10 = vmul.f32 %v1567_v26, %v532_v63  ;;  %v569_v11 = vmul.f32 %v1559_v23, %v532_v63  ;;  %v987_v13 = vsel %vm494_vm4, 1.0, %v1311_v30  ;;  %v389_v33 = vld [vmem:[%s1462_s13 + $0x218] sm:$0xff]  ;;  %v439_v34 = vld [vmem:[%s1462_s13 + $0x3a8] sm:$0xff]  ;;  %v1666_v46 = vadd.f32 -1.8, %v1551_v19  ;;  %v438_v49 = vld [vmem:[%s1462_s13 + $0x3a0] sm:$0xff] }
  0x5e   : > { %768 = vmatpush.msrb.mxu2 %v429_v17  ;;  %747 = vmatpush.msrb.mxu1 %v414_v20  ;;  %v519_v17 = vsub.f32 %v517_v1, %v518_v6  ;;  %v523_v18 = vsub.f32 %v521_v7, %v522_v54  ;;  %v1647_v20 = vadd.f32 -1.0, %v1551_v19  ;;  %v538_v31 = vmul.f32 %v987_v13, %v1615_v55  ;;  %v387_v60 = vld [vmem:[%s1462_s13 + $0x208] sm:$0xff]  ;;  %v405_v1 = vld [vmem:[%s1462_s13 + $0x298] sm:$0xff]  ;;  %v386_v6 = vld [vmem:[%s1462_s13 + $0x200] sm:$0xff] }
  0x5f   : > { %729 = vmatpush.msrb.mxu0 %v396_v16  ;;  %788 = vmatpush.msrb.mxu3 %v445_v28  ;;  %v570_v16 = vmul.f32 %v1570_v27, %v536_v4  ;;  %v567_v28 = vsub.f32 %v565_v5, %v566_v10  ;;  %v1660_v39 = vmul.f32 %v987_v13, %v1570_v27  ;;  %vm497_vm5 = vcmp.ge.f32.partialorder %v1551_v19, 0.6  ;;  %v436_v7 = vld [vmem:[%s1462_s13 + $0x390] sm:$0xff] }
  0x60   : > { %769 = vmatpush.msrb.mxu2 %v428_v21  ;;  %748 = vmatpush.msrb.mxu1 %v413_v29  ;;  %v408_v21 = vld [vmem:[%s1462_s13 + $0x2b0] sm:$0xff]  ;;  %v537_v29 = vmul.f32 %v1599_v44, %v1567_v26  ;;  %v524_v38 = vmul.f32 2.5, %v523_v18  ;;  %v573_v45 = vmul.f32 %v1562_v24, %v536_v4  ;;  %vm498_vm6 = vcmp.lt.f32.partialorder %v1551_v19, 1.0 }
  0x61   : > { %730 = vmatpush.msrb.mxu0 %v395_v25  ;;  %789 = vmatpush.msrb.mxu3 %v444_v37  ;;  %v422_v25 = vld [vmem:[%s1462_s13 + $0x320] sm:$0xff]  ;;  %v520_v37 = vmul.f32 2.5, %v519_v17  ;;  %v568_v40 = vmul.f32 1.25, %v567_v28  ;;  %vm499_vm7 = vmand %vm497_vm5, %vm498_vm6  ;;  %vm502_vm8 = vcmp.ge.f32.partialorder %v1551_v19, 1.0  ;;  %vm503_vm9 = vcmp.lt.f32.partialorder %v1551_v19, 1.4000001 }
  0x62   : > { %770 = vmatpush.msrb.mxu2 %v427_v32  ;;  %749 = vmatpush.msrb.mxu1 %v412_v42  ;;  %v1655_v32 = vadd.f32 -1.4000001, %v1551_v19  ;;  %v407_v42 = vld [vmem:[%s1462_s13 + $0x2a8] sm:$0xff]  ;;  %v539_v44 = vsub.f32 %v537_v29, %v538_v31  ;;  %vm504_vm10 = vmand %vm502_vm8, %vm503_vm9  ;;  %vm507_vm11 = vcmp.ge.f32.partialorder %v1551_v19, 1.4000001  ;;  %v434_v31 = vld [vmem:[%s1462_s13 + $0x380] sm:$0xff] }
  0x63   : > { %731 = vmatpush.msrb.mxu0 %v394_v36  ;;  %790 = vmatpush.msrb.mxu3 %v443_v48  ;;  %v571_v36 = vsub.f32 %v569_v11, %v570_v16  ;;  %v557_v50 = vmul.f32 %v1586_v35, %v520_v37  ;;  %v601_v53 = vmul.f32 %v1556_v22, %v568_v40  ;;  %v989_v10 = vsel %vm504_vm10, 1.0, %v1311_v30  ;;  %v435_v16 = vld [vmem:[%s1462_s13 + $0x388] sm:$0xff] }
  0x64   : > { %771 = vmatpush.msrb.mxu2 %v426_v43  ;;  %750 = vmatpush.msrb.mxu1 %v411_v51  ;;  %v421_v43 = vld [vmem:[%s1462_s13 + $0x318] sm:$0xff]  ;;  %v558_v51 = vmul.f32 %v1559_v23, %v524_v38  ;;  %v1674_v54 = vmul.f32 2.5, %v539_v44  ;;  %v1679_v58 = vmul.f32 %v1567_v26, %v568_v40  ;;  %vm508_vm12 = vcmp.lt.f32.partialorder %v1551_v19, 1.8  ;;  %v402_v44 = vld [vmem:[%s1462_s13 + $0x280] sm:$0xff] }
  0x65   : > { %732 = vmatpush.msrb.mxu0 %v393_v47  ;;  %791 = vmatpush.msrb.mxu3 %v442_v57  ;;  %v388_v47 = vld [vmem:[%s1462_s13 + $0x210] sm:$0xff]  ;;  %v572_v48 = vmul.f32 1.25, %v571_v36  ;;  %vm509_vm13 = vmand %vm507_vm11, %vm508_vm12  ;;  %v546_v29 = vmul.f32 %v989_v10, %v1655_v32  ;;  %v549_v36 = vmul.f32 %v989_v10, %v1647_v20  ;;  %vm512_vm14 = vcmp.ge.f32.partialorder %v1551_v19, 1.8  ;;  %v321_v40 = vld [vmem:[%s1456_s8 + $0x78] sm:$0xff] }
  0x66   : > { %772 = vmatpush.msrb.mxu2 %v425_v52  ;;  %751 = vmatpush.msrb.mxu1 %v410_v61  ;;  %v561_v52 = vmul.f32 %v1594_v41, %v524_v38  ;;  %v420_v57 = vld [vmem:[%s1462_s13 + $0x310] sm:$0xff]  ;;  %v559_v61 = vsub.f32 %v557_v50, %v558_v51  ;;  %v574_v63 = vmul.f32 %v1615_v55, %v1674_v54  ;;  %v990_v18 = vsel %vm509_vm13, 1.0, %v1311_v30 }
  0x67   : > { %733 = vmatpush.msrb.mxu0 %v392_v56  ;;  %792 = vmatpush.msrb.mxu3 %v441_v3  ;;  %v406_v56 = vld [vmem:[%s1462_s13 + $0x2a0] sm:$0xff]  ;;  %v602_v59 = vmul.f32 %v1570_v27, %v572_v48  ;;  %v1690_v0 = vmul.f32 %v1559_v23, %v572_v48  ;;  %v988_v23 = vsel %vm499_vm7, 1.0, %v1311_v30  ;;  %v1728_v48 = vadd.f32 -2.2, %v1551_v19 }
  0x68   : > { %773 = vmatpush.msrb.mxu2 %v424_v62  ;;  %752 = vmatpush.msrb.mxu1 %v409_v8  ;;  %v563_v22 = vsub.f32 %v561_v52, %v1640_v12  ;;  %v437_v62 = vld [vmem:[%s1462_s13 + $0x398] sm:$0xff]  ;;  %v560_v4 = vmul.f32 1.25, %v559_v61  ;;  %v575_v8 = vsub.f32 %v573_v45, %v574_v63  ;;  %vm513_vm15 = vcmp.lt.f32.partialorder %v1551_v19, 2.2  ;;  %v319_v61 = vld [vmem:[%s1456_s8 + $0x68] sm:$0xff] }
  0x69   : > { %734 = vmatpush.msrb.mxu0 %v391_v2  ;;  %793 = vmatpush.msrb.mxu3 %v440_v15  ;;  %v419_v2 = vld [vmem:[%s1462_s13 + $0x308] sm:$0xff]  ;;  %v603_v3 = vsub.f32 %v601_v53, %v602_v59  ;;  %v418_v15 = vld [vmem:[%s1462_s13 + $0x300] sm:$0xff]  ;;  %v553_v52 = vmul.f32 %v990_v18, %v1655_v32  ;;  %vm514_vm0 = vmand %vm512_vm14, %vm513_vm15 }
  0x6a   : > { %774 = vmatpush.msrb.mxu2 %v423_v9  ;;  %753 = vmatpush.msrb.mxu1 %v408_v21  ;;  %v564_v5 = vmul.f32 1.25, %v563_v22  ;;  %v404_v9 = vld [vmem:[%s1462_s13 + $0x290] sm:$0xff]  ;;  %v593_v12 = vmul.f32 %v1586_v35, %v560_v4  ;;  %v576_v17 = vmul.f32 1.25, %v575_v8  ;;  %v542_v21 = vmul.f32 %v988_v23, %v1647_v20  ;;  %v403_v35 = vld [vmem:[%s1462_s13 + $0x288] sm:$0xff] }
  0x6b   : > { %735 = vmatpush.msrb.mxu0 %v390_v14  ;;  %794 = vmatpush.msrb.mxu3 %v439_v34  ;;  %v604_v11 = vmul.f32 0.8333333, %v603_v3  ;;  %v991_v22 = vsel %vm514_vm0, 1.0, %v1311_v30  ;;  %v318_v3 = vld [vmem:[%s1456_s8 + $0x60] sm:$0xff] }
  0x6c   : > { %775 = vmatpush.msrb.mxu2 %v422_v25  ;;  %754 = vmatpush.msrb.mxu1 %v407_v42  ;;  %v594_v13 = vmul.f32 %v1562_v24, %v564_v5  ;;  %v597_v14 = vmul.f32 %v1594_v41, %v564_v5  ;;  %v545_v25 = vmul.f32 %v988_v23, %v1615_v55  ;;  %v317_v23 = vld [vmem:[%s1456_s8 + $0x58] sm:$0xff] }
  0x6d   : > { %736 = vmatpush.msrb.mxu0 %v389_v33  ;;  %795 = vmatpush.msrb.mxu3 %v438_v49  ;;  %v606_v33 = vmul.f32 %v1615_v55, %v576_v17  ;;  %v543_v34 = vsub.f32 %v1660_v39, %v542_v21  ;;  %v577_v39 = vmul.f32 %v1567_v26, %v1674_v54  ;;  %v320_v49 = vld [vmem:[%s1456_s8 + $0x70] sm:$0xff]  ;;  %v625_v54 = vsub.f32 0.0, %v1551_v19 }
  0x6e   : > { %776 = vmatpush.msrb.mxu2 %v421_v43  ;;  %755 = vmatpush.msrb.mxu1 %v406_v56  ;;  %v595_v28 = vsub.f32 %v593_v12, %v594_v13  ;;  %v599_v41 = vsub.f32 %v597_v14, %v1679_v58  ;;  %v547_v42 = vsub.f32 %v545_v25, %v546_v29  ;;  %v314_v29 = vld [vmem:[%s1456_s8 + $0x40] sm:$0xff] }
  0x6f   : > { %737 = vmatpush.msrb.mxu0 %v388_v47  ;;  %796 = vmatpush.msrb.mxu3 %v437_v62  ;;  %v550_v43 = vmul.f32 %v990_v18, %v1666_v46  ;;  %v607_v45 = vsub.f32 %v1690_v0, %v606_v33  ;;  %v544_v47 = vmul.f32 2.5, %v543_v34  ;;  %v554_v63 = vmul.f32 %v991_v22, %v1728_v48  ;;  %v313_v33 = vld [vmem:[%s1456_s8 + $0x38] sm:$0xff] }
  0x70   : > { %777 = vmatpush.msrb.mxu2 %v420_v57  ;;  %756 = vmatpush.msrb.mxu1 %v405_v1  ;;  %v596_v37 = vmul.f32 0.8333333, %v595_v28  ;;  %v600_v38 = vmul.f32 0.8333333, %v599_v41  ;;  %v548_v50 = vmul.f32 2.5, %v547_v42  ;;  %v609_v5 = vmul.f32 %v1562_v24, %v576_v17  ;;  %v316_v24 = vld [vmem:[%s1456_s8 + $0x50] sm:$0xff] }
  0x71   : > { %738 = vmatpush.msrb.mxu0 %v387_v60  ;;  %797 = vmatpush.msrb.mxu3 %v436_v7  ;;  %v551_v51 = vsub.f32 %v549_v36, %v550_v43  ;;  %v608_v53 = vmul.f32 0.8333333, %v607_v45  ;;  %v581_v56 = vmul.f32 %v1570_v27, %v544_v47  ;;  %v578_v57 = vmul.f32 %v1647_v20, %v544_v47  ;;  %v312_v36 = vld [vmem:[%s1456_s8 + $0x30] sm:$0xff] }
  0x72   : > { %778 = vmatpush.msrb.mxu2 %v419_v2  ;;  %757 = vmatpush.msrb.mxu1 %v404_v9  ;;  %v582_v59 = vmul.f32 %v1655_v32, %v548_v50  ;;  %v585_v60 = vmul.f32 %v1615_v55, %v548_v50  ;;  %v626_v0 = vmul.f32 1.442695, %v625_v54  ;;  %v307_v50 = vld [vmem:[%s1456_s8 + $0x8] sm:$0xff] }
  0x73   : > { %739 = vmatpush.msrb.mxu0 %v386_v6  ;;  %700 = vmatmul.f32.vlgmr.msra.gmra.mxu2 %v604_v11  ;;  %v552_v58 = vmul.f32 2.5, %v551_v51  ;;  %v579_v62 = vsub.f32 %v577_v39, %v578_v57  ;;  %v555_v6 = vsub.f32 %v553_v52, %v554_v63  ;;  %v308_v39 = vld [vmem:[%s1456_s8 + $0x10] sm:$0xff]  ;;  %v306_v52 = vld [vmem:[%s1456_s8] sm:$0xff] }
  0x74   : > { %779 = vmatpush.msrb.mxu2 %v418_v15  ;;  %798 = vmatpush.msrb.mxu3 %v435_v16  ;;  %v583_v1 = vsub.f32 %v581_v56, %v582_v59  ;;  %1090 = vpow2.f32 %v626_v0 }
  0x75   : > { %758 = vmatpush.msrb.mxu1 %v403_v35  ;;  %660 = vmatmul.f32.vlgmr.msra.gmra.mxu0 %v596_v37  ;;  %v586_v2 = vmul.f32 %v1666_v46, %v552_v58  ;;  %v580_v4 = vmul.f32 1.25, %v579_v62  ;;  %v556_v9 = vmul.f32 2.5, %v555_v6  ;;  %v589_v10 = vmul.f32 %v1647_v20, %v552_v58 }
  0x76   : > { %799 = vmatpush.msrb.mxu3 %v434_v31  ;;  %680 = vmatmul.f32.vlgmr.msra.gmra.mxu1 %v600_v38  ;;  %v584_v7 = vmul.f32 1.25, %v583_v1  ;;  %v311_v38 = vld [vmem:[%s1456_s8 + $0x28] sm:$0xff] }
  0x77   : > { %804 = vmatpush.msra.mxu0 %v321_v40  ;;  %759 = vmatpush.msrb.mxu1 %v402_v44  ;;  %v587_v30 = vsub.f32 %v585_v60, %v586_v2  ;;  %v610_v8 = vmul.f32 %v1647_v20, %v580_v4  ;;  %v613_v11 = vmul.f32 %v1567_v26, %v580_v4  ;;  %v315_v26 = vld [vmem:[%s1456_s8 + $0x48] sm:$0xff]  ;;  %v309_v44 = vld [vmem:[%s1456_s8 + $0x18] sm:$0xff] }
  0x78   : > { %720 = vmatmul.f32.vlgmr.msra.gmra.mxu3 %v608_v53  ;;  %v617_v13 = vmul.f32 %v1570_v27, %v584_v7  ;;  %v614_v14 = vmul.f32 %v1655_v32, %v584_v7  ;;  %v590_v16 = vmul.f32 %v1728_v48, %v556_v9 }
  0x79   : > { %805 = vmatpush.msra.mxu0 %v320_v49  ;;  %v588_v12 = vmul.f32 1.25, %v587_v30  ;;  %v611_v15 = vsub.f32 %v609_v5, %v610_v8 }
  0x7a   : > { %v615_v18 = vsub.f32 %v613_v11, %v614_v14  ;;  %v1091_v21 = vpop.eup %1090  ;;  %v591_v25 = vsub.f32 %v589_v10, %v590_v16 }
  0x7b   : > { %806 = vmatpush.msra.mxu0 %v319_v61  ;;  %v618_v17 = vmul.f32 %v1666_v46, %v588_v12  ;;  %v612_v20 = vmul.f32 0.8333333, %v611_v15  ;;  %v628_v28 = vadd.f32 1.0, %v1091_v21  ;;  %v621_v41 = vmul.f32 %v1615_v55, %v588_v12  ;;  %v310_v55 = vld [vmem:[%s1456_s8 + $0x20] sm:$0xff] }
  0x7c   : > { %v616_v27 = vmul.f32 0.8333333, %v615_v18  ;;  %v592_v32 = vmul.f32 1.25, %v591_v25 }
  0x7d   : > { %807 = vmatpush.msra.mxu0 %v318_v3  ;;  %v619_v35 = vsub.f32 %v617_v13, %v618_v17  ;;  %1092 = vrcp.f32 %v628_v28  ;;  %v640_v43 = vand.u32 2147483648, %v628_v28  ;;  %vm634_vm1 = vweird.f32 %v628_v28 }
  0x7e   : > { %740 = vmatmul.f32.vlgmr.msrb.gmra.mxu0 %v612_v20  ;;  %760 = vmatmul.f32.vlgmr.msrb.gmra.mxu1 %v616_v27  ;;  %v622_v46 = vmul.f32 %v1728_v48, %v592_v32  ;;  %v638_v47 = vand.u32 2147483647, %v628_v28 }
  0x7f   : > { %808 = vmatpush.msra.mxu0 %v317_v23  ;;  %v620_v31 = vmul.f32 0.8333333, %v619_v35  ;;  %v641_v49 = vor.u32 1.1754944e-38, %v640_v43 }
  0x80   : > { %v623_v34 = vsub.f32 %v621_v41, %v622_v46  ;;  %vm639_vm4 = vcmp.eq.f32.partialorder %v638_v47, 8.507059e+37 }
  0x81   : > { %809 = vmatpush.msra.mxu0 %v316_v24  ;;  %780 = vmatmul.f32.vlgmr.msrb.gmra.mxu2 %v620_v31 }
  0x82   : > { %v624_v37 = vmul.f32 0.8333333, %v623_v34 }
  0x83   : > { %810 = vmatpush.msra.mxu0 %v315_v26  ;;  %v1093_v40 = vpop.eup %1092 }
  0x84   : > { %800 = vmatmul.f32.vlgmr.msrb.gmra.mxu3 %v624_v37  ;;  %v630_v42 = vmul.f32 %v1093_v40, %v628_v28  ;;  %vm635_vm2 = vweird.f32 %v1093_v40 }
  0x85   : > { %811 = vmatpush.msra.mxu0 %v314_v29  ;;  %vm636_vm3 = vmor %vm634_vm1, %vm635_vm2 }
  0x86   : > { %v631_v45 = vsub.f32 1.0, %v630_v42 }
  0x87   : > { %812 = vmatpush.msra.mxu0 %v313_v33 }
  0x88   : > { %v632_v48 = vmul.f32 %v1093_v40, %v631_v45 }
  0x89   : > { %813 = vmatpush.msra.mxu0 %v312_v36 }
  0x8a   : > { %v633_v51 = vadd.f32 %v1093_v40, %v632_v48 }
  0x8b   : > { %814 = vmatpush.msra.mxu0 %v311_v38 }
  0x8c   : > { %v637_v53 = vsel %vm636_vm3, %v1093_v40, %v633_v51 }
  0x8d   : > { %815 = vmatpush.msra.mxu0 %v310_v55  ;;  %v642_v56 = vsel %vm639_vm4, %v641_v49, %v637_v53 }
  0x8e   : > { %v643_v57 = vmul.f32 %v642_v56, %v1551_v19 }
  0x8f   : > { %816 = vmatpush.msra.mxu0 %v309_v44 }
  0x91   : > { %817 = vmatpush.msra.mxu0 %v308_v39 }
  0x93   : > { %818 = vmatpush.msra.mxu0 %v307_v50 }
  0x95   : > { %819 = vmatpush.msra.mxu0 %v306_v52 }
  0x96   : > { %820 = vmatmul.f32.vlgmr.msra.gmra.mxu0 %v643_v57 }
  0xf2   : > { %v661_v58 = vpop.f32.mrf.mxu0 }
  0xf3   : > { %v681_v54 = vpop.f32.mrf.mxu1 }
  0xf4   : > { %v682_v59 = vadd.f32 %v681_v54, %v661_v58 }
  0xf6   : > { %v701_v60 = vpop.f32.mrf.mxu2 }
  0xf7   : > { %v702_v61 = vadd.f32 %v701_v60, %v682_v59 }
  0xfb   : > { %v721_v22 = vpop.f32.mrf.mxu3  ;;  %v741_v63 = vpop.f32.mrf.mxu0 }
  0xfc   : > { %v722_v62 = vadd.f32 %v721_v22, %v702_v61  ;;  %v761_v1 = vpop.f32.mrf.mxu1 }
  0xfe   : > { %v742_v0 = vadd.f32 %v741_v63, %v722_v62 }
 0x100   : > { %v762_v2 = vadd.f32 %v761_v1, %v742_v0 }
 0x104   : > { %v781_v3 = vpop.f32.mrf.mxu2 }
 0x105   : > { %v782_v4 = vadd.f32 %v781_v3, %v762_v2 }
 0x107   : > { %v801_v5 = vpop.f32.mrf.mxu3 }
 0x108   : > { %v802_v6 = vadd.f32 %v801_v5, %v782_v4 }
 0x112   : > { %828 = sbr.rel (%p992_p2) target bundleno = 289 (0x121), region = 60 }
 0x113   : > { %v821_v7 = vpop.f32.mrf.mxu0 }
 0x114   : > { %v822_v30 = vadd.f32 %v821_v7, %v802_v6 }
 0x116   : > { %824 = vst [vmem:[#allocation2] sm:$0xff] %v822_v30 }
 0x117   : > { %v1094_v23 = vld [vmem:[#allocation9] ss:$0 sm:$0xff] }
 0x11d   : > { %v829_v19 = vld [vmem:[#allocation2] sm:$0xff] }
 0x11e   : > { %v834_v8 = vadd.f32 %v1094_v23, %v829_v19 }
 0x120   : > { %835 = vst [vmem:[#allocation11] sm:$0xff] %v834_v8 }
 0x121 PF: > { %p1034_p3 = scmp.eq.s32.totalorder %s1410_s23, 3  ;;  %s846_s25 = sshll.u32 %s1795_s4, 4  ;;  %s847_s25 = int_to_ptr.hbm [resolvable:$true] %s846_s25 }
 0x122   : > { %s1312_s30 = smov [#allocation11]  }
 0x123   : > { %s844_s9 = sshll.u32 %s1312_s30, 4  ;;  %s845_s9 = int_to_ptr.vmem [resolvable:$true] %s844_s9 }
 0x124   : > { %1012 = dma.vmem_to_hbm [thread:$0]  (%p1034_p3), %s845_s9, 128, %s847_s25, [#allocation5]  }
 0x125   : > { %1280 = dma.done.wait (%p1034_p3), [#allocation5], 128  }
 0x126   : > { %1282 = vsyncadd (%p1034_p3), [#allocation5], 4294967168 }
 0x127 PF: > { %s20_s20 = sadd.s32 1, %s1305_s20   ;;  %s1800_s15 = smov %s1289_s16 }
 0x128   : > { %p17_p4 = scmp.ge.s32.totalorder %s20_s20, 6   ;;  %s1801_s16 = smov %s1293_s17 }
 0x129   : > { %s1802_s17 = smov %s1386_s28  ;;  %s1803_s18 = smov %s1301_s19 }
 0x12a   : > { %s1804_s19 = smov %s1806_s21  ;;  %19 = sbr.rel (!%p17_p4) target bundleno = 7 (0x7), region = 103 }
 0x12f   :  { %860 = vsyncpa [#allocation4], 1 }
 0x130   :  { %862 = vsyncpa [#allocation4 + $0x1], 1 }
 0x131   :  { %863 = vsyncpa [#allocation7], 1 }
 0x132   :  { %865 = vsyncpa [#allocation7 + $0x1], 1 }
 0x133   :  { %866 = vsyncpa [#allocation10], 1 }
 0x134   :  { %867 = vsyncpa [#allocation5], 1 }
 0x135   :  { %869 = vsyncpa [#allocation5 + $0x1], 1 }

</bundles_post_ra>
